<compile_context>
chip_gen: v6e
topology: v6e:2x2x1
jax: 0.10.0
libtpu: 0.0.40
codegen_flags: <defaults>
</compile_context>

<pallas_src>
import jax
import jax.numpy as jnp
from jax.experimental import pallas as pl
from jax.experimental.pallas import tpu as pltpu

_SUBLANE = 8
_MAX_TILE_B = 4096      # per-tile row cap; amortizes ~0.35 us/step grid overhead
_SINGLE_TILE_B = 1024   # at or below this, run the whole batch in one grid step


def _round_up(n, m):
    return (n + m - 1) // m * m


def mlp_kernel(x_ref, w1_ref, b1_ref, w2_ref, b2_ref, w3_ref, b3_ref, o_ref):
    # x arrives unpadded f32; cast to the matmul dtype in-kernel.
    x = x_ref[...].astype(w1_ref.dtype)

    # fc1 + leaky_relu(0.01) (PyTorch default slope); f32 accumulation.
    h1 = jnp.dot(x, w1_ref[...], preferred_element_type=jnp.float32) + b1_ref[...]
    h1 = jnp.maximum(h1, 0.01 * h1)

    # fc2 + tanh (tanh stays in f32 -> EUP).
    h2 = jnp.dot(h1.astype(w2_ref.dtype), w2_ref[...],
                 preferred_element_type=jnp.float32) + b2_ref[...]
    h2 = jnp.tanh(h2)

    # fc3 + relu; store unpadded (d_out-wide) f32 directly, no wrapper slice.
    h3 = jnp.dot(h2.astype(w3_ref.dtype), w3_ref[...],
                 preferred_element_type=jnp.float32) + b3_ref[...]
    o_ref[...] = jnp.maximum(h3, 0.0).astype(o_ref.dtype)


def prepare_params(w1, b1, w2, b2, w3, b3, matmul_dtype=jnp.bfloat16):
    """One-time: pre-cast weights to the MXU dtype; biases stay f32 [1, N].

    No feature-dim padding: BlockSpec dims that equal the full array dims are
    legal regardless of the (8,128) rule, and padding to 128 lanes buys no MXU
    time at these sizes while inflating DMA bytes.
    """
    return (w1.astype(matmul_dtype), b1.astype(jnp.float32),
            w2.astype(matmul_dtype), b2.astype(jnp.float32),
            w3.astype(matmul_dtype), b3.astype(jnp.float32))


def _pick_tiling(batch):
    if batch <= _SINGLE_TILE_B:
        # Single grid step; block dims equal the full array dims -> no padding.
        return batch, 1
    # >= 2 tiles and an even tile count so both v7x TensorCores get balanced
    # work under dimension_semantics=("parallel",).  Tile rows are a multiple
    # of 8 (sublane); the ragged last block is handled by Pallas (out-of-bounds
    # output rows are never written back).
    num_tiles = max(2, pl.cdiv(batch, _MAX_TILE_B))
    if num_tiles % 2:
        num_tiles += 1
    tile_b = _round_up(pl.cdiv(batch, num_tiles), _SUBLANE)
    return tile_b, pl.cdiv(batch, tile_b)


@jax.jit
def qlearner_forward(x, params):
    W1, B1, W2, B2, W3, B3 = params
    batch, d_in = x.shape
    h1 = W1.shape[1]
    h2 = W2.shape[1]
    d_out = W3.shape[1]

    tile_b, num_tiles = _pick_tiling(batch)

    # Constant-index blocks: weights/biases are DMA'd once and stay resident
    # across grid steps.
    full = lambda shape: pl.BlockSpec(shape, lambda i: (0,) * len(shape))

    return pl.pallas_call(
        mlp_kernel,
        out_shape=jax.ShapeDtypeStruct((batch, d_out), jnp.float32),
        grid=(num_tiles,),
        in_specs=[
            pl.BlockSpec((tile_b, d_in), lambda i: (i, 0)),
            full((d_in, h1)),
            full((1, h1)),
            full((h1, h2)),
            full((1, h2)),
            full((h2, d_out)),
            full((1, d_out)),
        ],
        out_specs=pl.BlockSpec((tile_b, d_out), lambda i: (i, 0)),
        compiler_params=pltpu.CompilerParams(
            dimension_semantics=("parallel",),
        ),
    )(x, W1, B1, W2, B2, W3, B3)


def init_linear(key, in_features, out_features):
    """Deterministic PyTorch-style Linear init; W as [in, out], b as [1, out]."""
    kw, kb = jax.random.split(key)
    bound = 1.0 / jnp.sqrt(in_features)
    w_torch = jax.random.uniform(kw, (out_features, in_features),
                                 minval=-bound, maxval=bound, dtype=jnp.float32)
    b = jax.random.uniform(kb, (1, out_features),
                           minval=-bound, maxval=bound, dtype=jnp.float32)
    return w_torch.T, b


def reference_forward(x, w1, b1, w2, b2, w3, b3, matmul_dtype=jnp.bfloat16):
    """Pure-JAX reference with the same bf16-matmul / f32-accumulate numerics."""
    dt = matmul_dtype
    h1 = jnp.dot(x.astype(dt), w1.astype(dt),
                 preferred_element_type=jnp.float32) + b1
    h1 = jnp.where(h1 > 0, h1, 0.01 * h1)
    h2 = jnp.tanh(jnp.dot(h1.astype(dt), w2.astype(dt),
                          preferred_element_type=jnp.float32) + b2)
    h3 = jnp.dot(h2.astype(dt), w3.astype(dt),
                 preferred_element_type=jnp.float32) + b3
    return jnp.maximum(h3, 0.0)


if __name__ == "__main__":
    state_size = 32
    batch = 8

    key = jax.random.PRNGKey(0)
    kx, k1, k2, k3 = jax.random.split(key, 4)

    x = jax.random.normal(kx, (batch, state_size), dtype=jnp.float32)
    w1, b1 = init_linear(k1, state_size, state_size * 2)
    w2, b2 = init_linear(k2, state_size * 2, state_size * 3)
    w3, b3 = init_linear(k3, state_size * 3, state_size)

    params = prepare_params(w1, b1, w2, b2, w3, b3)

    # Small batch (single grid step, fully unpadded).
    out = jax.block_until_ready(qlearner_forward(x, params))
    ref = reference_forward(x, w1, b1, w2, b2, w3, b3)
    assert out.shape == (batch, state_size)
    assert jnp.allclose(out, ref, atol=2e-3, rtol=2e-3), float(
        jnp.max(jnp.abs(out - ref)))

    # Tiny batch (non-multiple-of-8 rows, still a full-extent single block).
    x2 = jax.random.normal(k1, (3, state_size), dtype=jnp.float32)
    out2 = jax.block_until_ready(qlearner_forward(x2, params))
    ref2 = reference_forward(x2, w1, b1, w2, b2, w3, b3)
    assert out2.shape == (3, state_size)
    assert jnp.allclose(out2, ref2, atol=2e-3, rtol=2e-3), float(
        jnp.max(jnp.abs(out2 - ref2)))

    # Larger, non-multiple batch (multi-step grid + ragged last block path).
    xb = jax.random.normal(kx, (1029, state_size), dtype=jnp.float32)
    outb = jax.block_until_ready(qlearner_forward(xb, params))
    refb = reference_forward(xb, w1, b1, w2, b2, w3, b3)
    assert outb.shape == (1029, state_size)
    assert jnp.allclose(outb, refb, atol=2e-3, rtol=2e-3), float(
        jnp.max(jnp.abs(outb - refb)))

    print("KERNEL_OK")
</pallas_src>

<mosaic_0001>
module attributes {stable_mosaic.version = 11 : i64} {
  func.func @mlp_kernel(%arg0: i32, %arg1: memref<8x32xf32, #tpu.memory_space<vmem>>, %arg2: memref<32x64xbf16, #tpu.memory_space<vmem>>, %arg3: memref<1x64xf32, #tpu.memory_space<vmem>>, %arg4: memref<64x96xbf16, #tpu.memory_space<vmem>>, %arg5: memref<1x96xf32, #tpu.memory_space<vmem>>, %arg6: memref<96x32xbf16, #tpu.memory_space<vmem>>, %arg7: memref<1x32xf32, #tpu.memory_space<vmem>>, %arg8: memref<8x32xf32, #tpu.memory_space<vmem>>) attributes {dimension_semantics = [#tpu.dimension_semantics<parallel>], iteration_bounds = array<i64: 1>, scalar_prefetch = 0 : i64, scratch_operands = 0 : i64, tpu.core_type = #tpu.core_type<tc>, window_params = [{transform_indices = @transform_0, window_bounds = array<i64: 8, 32>}, {pipeline_mode = #tpu.pipeline_mode<synchronous>, transform_indices = @transform_1, window_bounds = array<i64: 32, 64>}, {pipeline_mode = #tpu.pipeline_mode<synchronous>, transform_indices = @transform_2, window_bounds = array<i64: 1, 64>}, {pipeline_mode = #tpu.pipeline_mode<synchronous>, transform_indices = @transform_3, window_bounds = array<i64: 64, 96>}, {pipeline_mode = #tpu.pipeline_mode<synchronous>, transform_indices = @transform_4, window_bounds = array<i64: 1, 96>}, {pipeline_mode = #tpu.pipeline_mode<synchronous>, transform_indices = @transform_5, window_bounds = array<i64: 96, 32>}, {pipeline_mode = #tpu.pipeline_mode<synchronous>, transform_indices = @transform_6, window_bounds = array<i64: 1, 32>}, {transform_indices = @transform_7, window_bounds = array<i64: 8, 32>}]} {
    %c0 = arith.constant 0 : index
    %c0_0 = arith.constant 0 : index
    %0 = vector.load %arg1[%c0, %c0_0] : memref<8x32xf32, #tpu.memory_space<vmem>>, vector<8x32xf32>
    %1 = arith.truncf %0 : vector<8x32xf32> to vector<8x32xbf16>
    %c0_1 = arith.constant 0 : index
    %c0_2 = arith.constant 0 : index
    %2 = vector.load %arg2[%c0_1, %c0_2] : memref<32x64xbf16, #tpu.memory_space<vmem>>, vector<32x64xbf16>
    %cst = arith.constant dense<0.000000e+00> : vector<8x64xf32>
    %3 = tpu.matmul %1, %2, %cst {dimension_numbers = #tpu.dot_dimension_numbers<[1], [0], [0], [1], [0, 0, 1, 1], [], []>} : vector<8x32xbf16>, vector<32x64xbf16>, vector<8x64xf32> -> vector<8x64xf32>
    %c0_3 = arith.constant 0 : index
    %c0_4 = arith.constant 0 : index
    %4 = vector.load %arg3[%c0_3, %c0_4] : memref<1x64xf32, #tpu.memory_space<vmem>>, vector<1x64xf32>
    %5 = vector.broadcast %4 : vector<1x64xf32> to vector<8x64xf32>
    %6 = arith.addf %3, %5 : vector<8x64xf32>
    %cst_5 = arith.constant 0.00999999977 : f32
    %7 = vector.broadcast %cst_5 : f32 to vector<8x64xf32>
    %8 = arith.mulf %7, %6 : vector<8x64xf32>
    %9 = arith.maximumf %6, %8 : vector<8x64xf32>
    %10 = arith.truncf %9 : vector<8x64xf32> to vector<8x64xbf16>
    %c0_6 = arith.constant 0 : index
    %c0_7 = arith.constant 0 : index
    %11 = vector.load %arg4[%c0_6, %c0_7] : memref<64x96xbf16, #tpu.memory_space<vmem>>, vector<64x96xbf16>
    %cst_8 = arith.constant dense<0.000000e+00> : vector<8x96xf32>
    %12 = tpu.matmul %10, %11, %cst_8 {dimension_numbers = #tpu.dot_dimension_numbers<[1], [0], [0], [1], [0, 0, 1, 1], [], []>} : vector<8x64xbf16>, vector<64x96xbf16>, vector<8x96xf32> -> vector<8x96xf32>
    %c0_9 = arith.constant 0 : index
    %c0_10 = arith.constant 0 : index
    %13 = vector.load %arg5[%c0_9, %c0_10] : memref<1x96xf32, #tpu.memory_space<vmem>>, vector<1x96xf32>
    %14 = vector.broadcast %13 : vector<1x96xf32> to vector<8x96xf32>
    %15 = arith.addf %12, %14 : vector<8x96xf32>
    %16 = math.tanh %15 : vector<8x96xf32>
    %17 = arith.truncf %16 : vector<8x96xf32> to vector<8x96xbf16>
    %c0_11 = arith.constant 0 : index
    %c0_12 = arith.constant 0 : index
    %18 = vector.load %arg6[%c0_11, %c0_12] : memref<96x32xbf16, #tpu.memory_space<vmem>>, vector<96x32xbf16>
    %cst_13 = arith.constant dense<0.000000e+00> : vector<8x32xf32>
    %19 = tpu.matmul %17, %18, %cst_13 {dimension_numbers = #tpu.dot_dimension_numbers<[1], [0], [0], [1], [0, 0, 1, 1], [], []>} : vector<8x96xbf16>, vector<96x32xbf16>, vector<8x32xf32> -> vector<8x32xf32>
    %c0_14 = arith.constant 0 : index
    %c0_15 = arith.constant 0 : index
    %20 = vector.load %arg7[%c0_14, %c0_15] : memref<1x32xf32, #tpu.memory_space<vmem>>, vector<1x32xf32>
    %21 = vector.broadcast %20 : vector<1x32xf32> to vector<8x32xf32>
    %22 = arith.addf %19, %21 : vector<8x32xf32>
    %cst_16 = arith.constant 0.000000e+00 : f32
    %23 = vector.broadcast %cst_16 : f32 to vector<8x32xf32>
    %24 = arith.maximumf %22, %23 : vector<8x32xf32>
    %c0_17 = arith.constant 0 : index
    %c0_18 = arith.constant 0 : index
    %25 = vector.load %arg8[%c0_17, %c0_18] : memref<8x32xf32, #tpu.memory_space<vmem>>, vector<8x32xf32>
    tpu.vector_store %arg8[%c0_17, %c0_18], %24 {strides = array<i32>} : memref<8x32xf32, #tpu.memory_space<vmem>>, vector<8x32xf32>,
    return
  }
  func.func @transform_0(%arg0: i32) -> (i32, i32) {
    %c0_i32 = arith.constant 0 : i32
    %c0_i32_0 = arith.constant 0 : i32
    return %arg0, %c0_i32 : i32, i32
  }
  func.func @transform_1(%arg0: i32) -> (i32, i32) {
    %c0_i32 = arith.constant 0 : i32
    %c0_i32_0 = arith.constant 0 : i32
    %c0_i32_1 = arith.constant 0 : i32
    return %c0_i32, %c0_i32_0 : i32, i32
  }
  func.func @transform_2(%arg0: i32) -> (i32, i32) {
    %c0_i32 = arith.constant 0 : i32
    %c0_i32_0 = arith.constant 0 : i32
    %c0_i32_1 = arith.constant 0 : i32
    return %c0_i32, %c0_i32_0 : i32, i32
  }
  func.func @transform_3(%arg0: i32) -> (i32, i32) {
    %c0_i32 = arith.constant 0 : i32
    %c0_i32_0 = arith.constant 0 : i32
    %c0_i32_1 = arith.constant 0 : i32
    return %c0_i32, %c0_i32_0 : i32, i32
  }
  func.func @transform_4(%arg0: i32) -> (i32, i32) {
    %c0_i32 = arith.constant 0 : i32
    %c0_i32_0 = arith.constant 0 : i32
    %c0_i32_1 = arith.constant 0 : i32
    return %c0_i32, %c0_i32_0 : i32, i32
  }
  func.func @transform_5(%arg0: i32) -> (i32, i32) {
    %c0_i32 = arith.constant 0 : i32
    %c0_i32_0 = arith.constant 0 : i32
    %c0_i32_1 = arith.constant 0 : i32
    return %c0_i32, %c0_i32_0 : i32, i32
  }
  func.func @transform_6(%arg0: i32) -> (i32, i32) {
    %c0_i32 = arith.constant 0 : i32
    %c0_i32_0 = arith.constant 0 : i32
    %c0_i32_1 = arith.constant 0 : i32
    return %c0_i32, %c0_i32_0 : i32, i32
  }
  func.func @transform_7(%arg0: i32) -> (i32, i32) {
    %c0_i32 = arith.constant 0 : i32
    %c0_i32_0 = arith.constant 0 : i32
    return %arg0, %c0_i32 : i32, i32
  }
}

</mosaic_0001>

<bundles_post_ra>
// kernel: qlearner_forward.1
= control target key start
LH: loop header
LB: loop body
LE: loop exit
PB: predicated region body
PF: predicated region fallthrough
CT: control target
= control target key end

     0   :  { %v408_v1 = vmov 0.0   ;;  %vm409_vm0 = vmmov 0   ;;  %vm53_vm1 = vcmask 261120   ;;  %s504_s0 = inlined_call_operand.vmem [shape: f32[8,32], index: 0, kind: input, shape index: {}]   ;;  %s505_s1 = inlined_call_operand.vmem [shape: bf16[32,64], index: 1, kind: input, shape index: {}]   ;;  %s506_s2 = inlined_call_operand.vmem [shape: f32[1,64], index: 2, kind: input, shape index: {}]   ;;  %s507_s3 = inlined_call_operand.vmem [shape: bf16[64,96], index: 3, kind: input, shape index: {}]   ;;  %s508_s4 = inlined_call_operand.vmem [shape: f32[1,96], index: 4, kind: input, shape index: {}]   ;;  %s509_s5 = inlined_call_operand.vmem [shape: bf16[96,32], index: 5, kind: input, shape index: {}]   ;;  %s510_s6 = inlined_call_operand.vmem [shape: f32[1,32], index: 6, kind: input, shape index: {}]   ;;  %s511_s7 = inlined_call_operand.hbm [shape: f32[8,32], index: 7, kind: output, shape index: {}]  }
   0x1   :  { %v372_v0 = vld [vmem:[%s505_s1 + $0x8] sm:$0xff]   ;;  %333 = vmatprep.subr.bf16.mxu1 %v408_v1  ;;  %v373_v2 = vld [vmem:[%s505_s1] sm:$0xff]   ;;  %353 = vmatprep.subr.bf16.mxu0 %v408_v1  ;;  %v374_v4 = vld [vmem:[%s507_s3 + $0x18] sm:$0xff]  }
   0x2   :  { %334 = vmatpush3.bf16.msra.mxu1 %v372_v0  ;;  %337 = vmatprep.mubr.msk.bf16.mxu1 %vm409_vm0, %v408_v1  ;;  %v28_v3 = vld [vmem:[%s504_s0] sm:$0xff]  ;;  %v375_v6 = vld [vmem:[%s507_s3 + $0x10] sm:$0xff]  }
   0x3   :  { %335 = vmatprep.subr.bf16.mxu1 %v408_v1  ;;  %365 = vmatprep.mubr.msk.bf16.mxu0 %vm409_vm0, %v408_v1  ;;  %v29_v5 = vpack.c.bf16 %v28_v3, %v28_v3 }
   0x6   :  { %336 = vmatpush3.bf16.msra.mxu1 %v373_v2 }
   0x7   :  { %341 = vmatprep.subr.bf16.mxu1 %v408_v1 }
   0x9   :  { %338 = vmatmul.mubr.msk.bf16.vlgmr.msra.gmra.mxu1 %vm53_vm1, %v29_v5 }
   0xa   :  { %342 = vmatpush3.bf16.msra.mxu1 %v374_v4  ;;  %349 = vmatprep.mubr.msk.bf16.mxu1 %vm409_vm0, %v408_v1 }
   0xb   :  { %12 = vsyncpa [#allocation3], 0  ;;  %343 = vmatprep.subr.bf16.mxu1 %v408_v1  ;;  %v376_v7 = vld [vmem:[%s507_s3 + $0x8] sm:$0xff]   ;;  %v377_v8 = vld [vmem:[%s507_s3] sm:$0xff]   ;;  %vm139_vm2 = vcmask 523264   ;;  %vm240_vm3 = vcmask 785408  }
   0xc   :  { %v378_v9 = vld [vmem:[%s509_s5 + $0x28] sm:$0xff]   ;;  %v300_v10 = vld [vmem:[%s506_s2] ss:$0 sm:$0xff]  ;;  %v380_v20 = vld [vmem:[%s509_s5 + $0x18] sm:$0xff]  }
   0xd   :  { %354 = vmatpush3.bf16.msra.mxu0 %v378_v9  ;;  %v379_v19 = vld [vmem:[%s509_s5 + $0x20] sm:$0xff]   ;;  %v381_v21 = vld [vmem:[%s509_s5 + $0x10] sm:$0xff]   ;;  %v382_v22 = vld [vmem:[%s509_s5 + $0x8] sm:$0xff]  }
   0xe   :  { %344 = vmatpush3.bf16.msra.mxu1 %v375_v6  ;;  %355 = vmatprep.subr.bf16.mxu0 %v408_v1  ;;  %v383_v23 = vld [vmem:[%s509_s5] sm:$0xff]   ;;  %s410_s5 = smov [#allocation2]  }
   0xf   :  { %345 = vmatprep.subr.bf16.mxu1 %v408_v1  ;;  %v304_v24 = vld [vmem:[%s508_s4] ss:$0 sm:$0xff]  ;;  %s292_s29 = sshll.u32 %s410_s5, 4  ;;  %s293_s29 = int_to_ptr.vmem [resolvable:$true] %s292_s29 }
  0x10   :  { %v310_v32 = vld [vmem:[%s510_s6] ss:$0 sm:$0xff]  ;;  %s386_s4 = scalar_lea.vmem %s293_s29, 128  ;;  %p391_p1 = scmp.lt.s32.totalorder %s293_s29, %s293_s29 }
  0x11   :  { %356 = vmatpush3.bf16.msra.mxu0 %v379_v19  ;;  %p387_p0 = scmp.ne.s32.totalorder %s293_s29, %s386_s4  ;;  %p392_p2 = scmp.lt.s32.totalorder %s386_s4, %s386_s4 }
  0x12   :  { %346 = vmatpush3.bf16.msra.mxu1 %v376_v7  ;;  %357 = vmatprep.subr.bf16.mxu0 %v408_v1 }
  0x13   :  { %347 = vmatprep.subr.bf16.mxu1 %v408_v1  ;;  %p393_p3 = por %p392_p2, %p391_p1 }
  0x15   :  { %358 = vmatpush3.bf16.msra.mxu0 %v380_v20  ;;  %p394_p4 = pnand %p393_p3, %p387_p0 }
  0x16   :  { %348 = vmatpush3.bf16.msra.mxu1 %v377_v8  ;;  %359 = vmatprep.subr.bf16.mxu0 %v408_v1 }
  0x19   :  { %360 = vmatpush3.bf16.msra.mxu0 %v381_v21 }
  0x1a   :  { %361 = vmatprep.subr.bf16.mxu0 %v408_v1 }
  0x1d   :  { %362 = vmatpush3.bf16.msra.mxu0 %v382_v22 }
  0x1e   :  { %363 = vmatprep.subr.bf16.mxu0 %v408_v1 }
  0x21   :  { %364 = vmatpush3.bf16.msra.mxu0 %v383_v23 }
  0xc9   :  { %v91_v11 = vpop.f32.mrf.mxu1 }
  0xca   :  { %v92_v12 = vadd.f32 %v300_v10, %v91_v11 }
  0xcb   :  { %v339_v13 = vpop.f32.mrf.mxu1 }
  0xcc   :  { %v97_v14 = vmul.f32 0.01, %v92_v12 }
  0xcd   :  { %v94_v15 = vpop.f32.mrf.mxu1 }
  0xce   :  { %v98_v16 = vmax.f32 %v92_v12, %v97_v14 }
  0xcf   :  { %v340_v17 = vpop.f32.mrf.mxu1 }
  0xd0   :  { %v99_v18 = vpack.c.bf16 %v98_v16, %v98_v16 }
  0xd2   :  { %350 = vmatmul.mubr.msk.bf16.vlgmr.msra.gmra.mxu1 %vm139_vm2, %v99_v18 }
 0x192   :  { %v177_v25 = vpop.f32.mrf.mxu1 }
 0x193   :  { %v178_v26 = vadd.f32 %v304_v24, %v177_v25 }
 0x194   :  { %v351_v27 = vpop.f32.mrf.mxu1 }
 0x195   :  { %384 = vtanh.f32 %v178_v26 }
 0x196   :  { %v180_v28 = vpop.f32.mrf.mxu1 }
 0x198   :  { %v352_v29 = vpop.f32.mrf.mxu1 }
 0x1a2   :  { %v385_v30 = vpop.eup %384 }
 0x1a3   :  { %v184_v31 = vpack.c.bf16 %v385_v30, %v385_v30 }
 0x1a5   :  { %366 = vmatmul.mubr.msk.bf16.vlgmr.msra.gmra.mxu0 %vm240_vm3, %v184_v31 }
 0x265   :  { %v278_v33 = vpop.f32.mrf.mxu0 }
 0x266   :  { %v279_v34 = vadd.f32 %v310_v32, %v278_v33 }
 0x267   :  { %v367_v35 = vpop.f32.mrf.mxu0 }
 0x268   :  { %v284_v36 = vmax.f32 %v279_v34, 0.0 }
 0x269   :  { %v281_v37 = vpop.f32.mrf.mxu0 }
 0x26a   :  { %285 = vst.msk [vmem:[#allocation2] sm:$0xff] %vm53_vm1, %v284_v36 }
 0x26b   :  { %v368_v38 = vpop.f32.mrf.mxu0 }
 0x26c   :  { %397 = shalt.err (!%p394_p4)
}
 0x26d   :  { %295 = dma.vmem_to_hbm [thread:$0]  %s293_s29, 128, %s511_s7, [#allocation3]  }
 0x26e   :  { %406 = dma.done.wait [#allocation3], 128  }
 0x26f   :  { %407 = vsyncadd [#allocation3], 4294967168 }
 0x270   :  { %299 = vsyncpa [#allocation3], 1 }

</bundles_post_ra>
